<compile_context>
chip_gen: v5e
topology: v5e:2x2
jax: 0.10.0
libtpu: 0.0.40
codegen_flags: <defaults>
</compile_context>

<pallas_src>
import jax
import jax.numpy as jnp
from jax.experimental import pallas as pl
from jax.experimental.pallas import tpu as pltpu


def _layernorm_kernel(x_ref, w_ref, b_ref, o_ref):
    # x_ref: (tm, C) tile of rows; w_ref/b_ref: (1, C) f32 affine params.
    x = x_ref[...].astype(jnp.float32)
    c = x.shape[-1]
    inv_c = 1.0 / c

    # Two independent cross-lane reductions (single pass over the tile):
    # sum(x) and sum(x*x) have no data dependency, so they can overlap on
    # the XLUs instead of serializing mean -> (x - mu)^2 -> mean.
    s1 = jnp.sum(x, axis=-1, keepdims=True)
    s2 = jnp.sum(x * x, axis=-1, keepdims=True)

    mu = s1 * inv_c
    # Population variance (unbiased=False): E[x^2] - mu^2, clamped for safety.
    var = jnp.maximum(s2 * inv_c - mu * mu, 0.0)
    inv = jax.lax.rsqrt(var + 1e-5)          # EUP transcendental (free slot)

    y = (x - mu) * inv
    o_ref[...] = (y * w_ref[...] + b_ref[...]).astype(o_ref.dtype)


def withbias_layernorm(x, weight, bias, *, target_tile_bytes=1 << 20):
    """LayerNorm over the last dim of x, matching WithBias_LayerNorm.forward."""
    orig_shape = x.shape
    C = orig_shape[-1]
    rows = 1
    for d in orig_shape[:-1]:
        rows *= int(d)
    rows = max(rows, 1)

    x2 = x.reshape(rows, C)
    # Cast affine params to f32 once, outside the grid loop.
    w2 = weight.reshape(1, C).astype(jnp.float32)
    b2 = bias.reshape(1, C).astype(jnp.float32)

    # ---- Row-tile selection -------------------------------------------------
    itemsize = jnp.dtype(x.dtype).itemsize
    sub = max(8, 32 // max(itemsize, 1))      # sublane pack: 8 f32, 16 bf16, 32 i8
    # Size the tile so the f32 working copy of x is ~target_tile_bytes
    # (big enough to amortize the ~0.35us per-grid-step overhead).
    target_rows = max(sub, target_tile_bytes // (4 * C))
    tm = max(sub, (target_rows // sub) * sub)

    # Keep at least `min_grid` grid steps when there are enough rows, so the
    # parallel row axis can be split across v7x's two TensorCores.
    min_grid = 4
    if rows >= min_grid * sub:
        cap = (rows + min_grid - 1) // min_grid
        cap = ((cap + sub - 1) // sub) * sub
        tm = min(tm, cap)

    if tm >= rows:
        tm = rows                              # full-extent block: always legal
    # else: tm is a multiple of `sub`; the partial tail block (if any) is
    # masked by Pallas (rows are independent, so this is safe).

    grid = (pl.cdiv(rows, tm),)

    out = pl.pallas_call(
        _layernorm_kernel,
        out_shape=jax.ShapeDtypeStruct((rows, C), x.dtype),
        grid_spec=pltpu.PrefetchScalarGridSpec(
            num_scalar_prefetch=0,
            grid=grid,
            in_specs=[
                pl.BlockSpec((tm, C), lambda i: (i, 0)),   # x rows tile
                pl.BlockSpec((1, C), lambda i: (0, 0)),    # weight (broadcast)
                pl.BlockSpec((1, C), lambda i: (0, 0)),    # bias (broadcast)
            ],
            out_specs=pl.BlockSpec((tm, C), lambda i: (i, 0)),
        ),
        compiler_params=pltpu.CompilerParams(
            dimension_semantics=("parallel",),
            # Double-buffered in/out tiles + compiler temporaries stay well
            # inside 32 MiB, which is <= physical VMEM on v5e/v6e/v7x.
            vmem_limit_bytes=32 * 1024 * 1024,
        ),
    )(x2, w2, b2)
    return out.reshape(orig_shape)


def _reference(x, weight, bias):
    x32 = x.astype(jnp.float32)
    mu = jnp.mean(x32, axis=-1, keepdims=True)
    var = jnp.mean((x32 - mu) ** 2, axis=-1, keepdims=True)
    return ((x32 - mu) / jnp.sqrt(var + 1e-5) * weight.astype(jnp.float32)
            + bias.astype(jnp.float32)).astype(x.dtype)


if __name__ == "__main__":
    key = jax.random.PRNGKey(0)
    kx, kw, kb = jax.random.split(key, 3)

    # Module shapes: normalized_shape = (hidden,) -> weight/bias of shape (hidden,)
    batch, seq, hidden = 2, 64, 32
    x = jax.random.normal(kx, (batch, seq, hidden), dtype=jnp.float32)
    # nn.Parameter init is ones/zeros; perturb deterministically so the
    # affine path is actually exercised.
    weight = jnp.ones((hidden,), jnp.float32) + 0.1 * jax.random.normal(kw, (hidden,), jnp.float32)
    bias = 0.1 * jax.random.normal(kb, (hidden,), jnp.float32)

    out = withbias_layernorm(x, weight, bias)
    out = jax.block_until_ready(out)

    ref = _reference(x, weight, bias)
    assert out.shape == x.shape
    assert jnp.allclose(out, ref, atol=1e-4, rtol=1e-4), "mismatch vs reference"

    print("KERNEL_OK")
</pallas_src>

<mosaic_0001>
module attributes {stable_mosaic.version = 11 : i64} {
  func.func @_layernorm_kernel(%arg0: i32, %arg1: memref<32x32xf32, #tpu.memory_space<vmem>>, %arg2: memref<1x32xf32, #tpu.memory_space<vmem>>, %arg3: memref<1x32xf32, #tpu.memory_space<vmem>>, %arg4: memref<32x32xf32, #tpu.memory_space<vmem>>) attributes {dimension_semantics = [#tpu.dimension_semantics<parallel>], iteration_bounds = array<i64: 4>, scalar_prefetch = 0 : i64, scratch_operands = 0 : i64, tpu.core_type = #tpu.core_type<tc>, window_params = [{transform_indices = @transform_0, window_bounds = array<i64: 32, 32>}, {pipeline_mode = #tpu.pipeline_mode<synchronous>, transform_indices = @transform_1, window_bounds = array<i64: 1, 32>}, {pipeline_mode = #tpu.pipeline_mode<synchronous>, transform_indices = @transform_2, window_bounds = array<i64: 1, 32>}, {transform_indices = @transform_3, window_bounds = array<i64: 32, 32>}]} {
    %c0 = arith.constant 0 : index
    %c0_0 = arith.constant 0 : index
    %0 = vector.load %arg1[%c0, %c0_0] : memref<32x32xf32, #tpu.memory_space<vmem>>, vector<32x32xf32>
    %cst = arith.constant dense<0.000000e+00> : vector<32xf32>
    %1 = vector.multi_reduction <add>, %0, %cst [1] : vector<32x32xf32> to vector<32xf32>
    %2 = vector.shape_cast %1 : vector<32xf32> to vector<32x1xf32>
    %3 = arith.mulf %0, %0 : vector<32x32xf32>
    %cst_1 = arith.constant dense<0.000000e+00> : vector<32xf32>
    %4 = vector.multi_reduction <add>, %3, %cst_1 [1] : vector<32x32xf32> to vector<32xf32>
    %5 = vector.shape_cast %4 : vector<32xf32> to vector<32x1xf32>
    %cst_2 = arith.constant 3.125000e-02 : f32
    %6 = vector.broadcast %cst_2 : f32 to vector<32x1xf32>
    %7 = arith.mulf %2, %6 : vector<32x1xf32>
    %cst_3 = arith.constant 3.125000e-02 : f32
    %8 = vector.broadcast %cst_3 : f32 to vector<32x1xf32>
    %9 = arith.mulf %5, %8 : vector<32x1xf32>
    %10 = arith.mulf %7, %7 : vector<32x1xf32>
    %11 = arith.subf %9, %10 : vector<32x1xf32>
    %cst_4 = arith.constant 0.000000e+00 : f32
    %12 = vector.broadcast %cst_4 : f32 to vector<32x1xf32>
    %13 = arith.maximumf %11, %12 : vector<32x1xf32>
    %cst_5 = arith.constant 9.99999974E-6 : f32
    %14 = vector.broadcast %cst_5 : f32 to vector<32x1xf32>
    %15 = arith.addf %13, %14 : vector<32x1xf32>
    %16 = math.rsqrt %15 : vector<32x1xf32>
    %17 = vector.broadcast %7 : vector<32x1xf32> to vector<32x32xf32>
    %18 = arith.subf %0, %17 : vector<32x32xf32>
    %19 = vector.broadcast %16 : vector<32x1xf32> to vector<32x32xf32>
    %20 = arith.mulf %18, %19 : vector<32x32xf32>
    %c0_6 = arith.constant 0 : index
    %c0_7 = arith.constant 0 : index
    %21 = vector.load %arg2[%c0_6, %c0_7] : memref<1x32xf32, #tpu.memory_space<vmem>>, vector<1x32xf32>
    %22 = vector.broadcast %21 : vector<1x32xf32> to vector<32x32xf32>
    %23 = arith.mulf %20, %22 : vector<32x32xf32>
    %c0_8 = arith.constant 0 : index
    %c0_9 = arith.constant 0 : index
    %24 = vector.load %arg3[%c0_8, %c0_9] : memref<1x32xf32, #tpu.memory_space<vmem>>, vector<1x32xf32>
    %25 = vector.broadcast %24 : vector<1x32xf32> to vector<32x32xf32>
    %26 = arith.addf %23, %25 : vector<32x32xf32>
    %c0_10 = arith.constant 0 : index
    %c0_11 = arith.constant 0 : index
    %27 = vector.load %arg4[%c0_10, %c0_11] : memref<32x32xf32, #tpu.memory_space<vmem>>, vector<32x32xf32>
    tpu.vector_store %arg4[%c0_10, %c0_11], %26 {strides = array<i32>} : memref<32x32xf32, #tpu.memory_space<vmem>>, vector<32x32xf32>,
    return
  }
  func.func @transform_0(%arg0: i32) -> (i32, i32) {
    %c0_i32 = arith.constant 0 : i32
    %c0_i32_0 = arith.constant 0 : i32
    return %arg0, %c0_i32 : i32, i32
  }
  func.func @transform_1(%arg0: i32) -> (i32, i32) {
    %c0_i32 = arith.constant 0 : i32
    %c0_i32_0 = arith.constant 0 : i32
    %c0_i32_1 = arith.constant 0 : i32
    return %c0_i32, %c0_i32_0 : i32, i32
  }
  func.func @transform_2(%arg0: i32) -> (i32, i32) {
    %c0_i32 = arith.constant 0 : i32
    %c0_i32_0 = arith.constant 0 : i32
    %c0_i32_1 = arith.constant 0 : i32
    return %c0_i32, %c0_i32_0 : i32, i32
  }
  func.func @transform_3(%arg0: i32) -> (i32, i32) {
    %c0_i32 = arith.constant 0 : i32
    %c0_i32_0 = arith.constant 0 : i32
    return %arg0, %c0_i32 : i32, i32
  }
}

</mosaic_0001>

<bundles_post_ra>
// kernel: tpu_custom_call.1
= control target key start
LH: loop header
LB: loop body
LE: loop exit
PB: predicated region body
PF: predicated region fallthrough
CT: control target
= control target key end

     0   :  { %s412_s12 = smov 0   ;;  %s499_s0 = inlined_call_operand.vmem [shape: f32[128,32], index: 0, kind: input, shape index: {}]   ;;  %s500_s1 = inlined_call_operand.vmem [shape: f32[1,32], index: 1, kind: input, shape index: {}]   ;;  %s501_s2 = inlined_call_operand.vmem [shape: f32[1,32], index: 2, kind: input, shape index: {}]   ;;  %s502_s3 = inlined_call_operand.vmem [shape: f32[128,32], index: 3, kind: output, shape index: {}]  }
   0x1 LB: > { %s355_s13 = sadd.s32 4294967295, %s390_s12   ;;  %p359_p0 = scmp.ge.s32.totalorder %s390_s12, 1  ;;  %s390_s12 = sphi %s412_s12, %s13_s12  }
   0x2   : > { %p138_p1 = scmp.lt.s32.totalorder %s390_s12, 5 }
   0x4   : > { %p139_p2 = pnand %p359_p0, %p138_p1 }
   0x5   : > { %s360_s14 = sshll.u32 (!%p139_p2), %s355_s13, 2 }
   0x6   : > { %142 = sbr.rel (%p139_p2) target bundleno = 182 (0xb6), region = 32  ;;  %p163_p3 = scmp.lt.s32.totalorder (!%p139_p2), %s360_s14, 15 }
   0xb   : > { %s504_s14 = smov (!%p163_p3, %s360_s14), 15  ;;  %vm178_vm0 = vcmask 261120   ;;  %v374_v57 = vld [vmem:[%s500_s1] ss:$0 sm:$0xff] }
   0xc   : > { %s361_s15 = sshll.u32 %s504_s14, 3  ;;  %v375_v60 = vld [vmem:[%s501_s2] ss:$0 sm:$0xff] }
   0xd   : > { %s166_s18 = scalar_lea.vmem %s499_s0, %s361_s15  ;;  %s480_s25 = scalar_lea.vmem %s502_s3, %s361_s15 }
   0xe   : > { %v428_v0 = vld [vmem:[%s166_s18 + $0x10] sm:$0xff]  ;;  %v430_v1 = vld [vmem:[%s166_s18] sm:$0xff]  ;;  %v438_v5 = vld [vmem:[%s166_s18 + $0x8] sm:$0xff] }
   0xf   : > { %v185_v2 = vsel %vm178_vm0, %v428_v0, 0.0  ;;  %v179_v3 = vsel %vm178_vm0, %v430_v1, 0.0  ;;  %v191_v4 = vmul.f32 %v430_v1, %v430_v1  ;;  %v441_v7 = vld [vmem:[%s166_s18 + $0x18] sm:$0xff]  ;;  %v192_v8 = vmul.f32 %v438_v5, %v438_v5 }
  0x10   : > { %186 = vadd.xlane.f32.xlu1 %v185_v2  ;;  %180 = vadd.xlane.f32.xlu0 %v179_v3  ;;  %v188_v9 = vsel %vm178_vm0, %v441_v7, 0.0  ;;  %v182_v10 = vsel %vm178_vm0, %v438_v5, 0.0  ;;  %v194_v12 = vmul.f32 %v441_v7, %v441_v7  ;;  %v193_v13 = vmul.f32 %v428_v0, %v428_v0 }
  0x11   : > { %v195_v6 = vsel %vm178_vm0, %v191_v4, 0.0  ;;  %v198_v11 = vsel %vm178_vm0, %v192_v8, 0.0 }
  0x12   : > { %196 = vadd.xlane.f32.xlu2 %v195_v6  ;;  %v204_v14 = vsel %vm178_vm0, %v194_v12, 0.0  ;;  %v201_v15 = vsel %vm178_vm0, %v193_v13, 0.0 }
  0x18   : > { %189 = vadd.xlane.f32.xlu1 %v188_v9  ;;  %183 = vadd.xlane.f32.xlu0 %v182_v10 }
  0x1a   : > { %199 = vadd.xlane.f32.xlu2 %v198_v11 }
  0x20   : > { %205 = vadd.xlane.f32.xlu1 %v204_v14  ;;  %202 = vadd.xlane.f32.xlu0 %v201_v15 }
  0x83   : > { %v187_v16 = vpop.xlane.xlu1 %186  ;;  %v181_v17 = vpop.xlane.xlu0 %180 }
  0x84   : > { %v207_v18 = vmul.f32 0.03125, %v181_v17  ;;  %v460_v31 = vmul.f32 0.03125, %v187_v16 }
  0x85   : > { %v197_v19 = vpop.xlane.xlu2 %196 }
  0x86   : > { %v215_v20 = vmul.f32 %v207_v18, %v207_v18  ;;  %v211_v21 = vmul.f32 0.03125, %v197_v19  ;;  %v217_v37 = vmul.f32 %v460_v31, %v460_v31  ;;  %v271_v56 = vsub.f32 %v430_v1, %v207_v18 }
  0x88   : > { %v219_v22 = vsub.f32 %v211_v21, %v215_v20 }
  0x8a   : > { %v223_v23 = vmax.f32 %v219_v22, 0.0  ;;  %v273_v22 = vsub.f32 %v428_v0, %v460_v31 }
  0x8b   : > { %v190_v24 = vpop.xlane.xlu1 %189  ;;  %v184_v25 = vpop.xlane.xlu0 %183 }
  0x8c   : > { %v456_v26 = vmul.f32 0.03125, %v184_v25  ;;  %v227_v27 = vadd.f32 1e-05, %v223_v23  ;;  %v462_v32 = vmul.f32 0.03125, %v190_v24 }
  0x8d   : > { %v200_v28 = vpop.xlane.xlu2 %199 }
  0x8e   : > { %v216_v29 = vmul.f32 %v456_v26, %v456_v26  ;;  %376 = vrsqrt.f32 %v227_v27  ;;  %v212_v30 = vmul.f32 0.03125, %v200_v28  ;;  %v218_v38 = vmul.f32 %v462_v32, %v462_v32 }
  0x8f   : > { %vm237_vm2 = vweird.f32 %v227_v27  ;;  %v272_v12 = vsub.f32 %v438_v5, %v456_v26  ;;  %v274_v21 = vsub.f32 %v441_v7, %v462_v32 }
  0x90   : > { %v220_v33 = vsub.f32 %v212_v30, %v216_v29 }
  0x92   : > { %v224_v34 = vmax.f32 %v220_v33, 0.0 }
  0x93   : > { %v206_v35 = vpop.xlane.xlu1 %205  ;;  %v203_v36 = vpop.xlane.xlu0 %202 }
  0x94   : > { %v214_v39 = vmul.f32 0.03125, %v206_v35  ;;  %v213_v40 = vmul.f32 0.03125, %v203_v36  ;;  %v377_v41 = vpop.eup %376  ;;  %v228_v42 = vadd.f32 1e-05, %v224_v34 }
  0x95   : > { %v232_v43 = vmul.f32 %v377_v41, %v227_v27  ;;  %vm238_vm1 = vweird.f32 %v377_v41 }
  0x96   : > { %v222_v44 = vsub.f32 %v214_v39, %v218_v38  ;;  %v221_v45 = vsub.f32 %v213_v40, %v217_v37  ;;  %378 = vrsqrt.f32 %v228_v42  ;;  %vm239_vm3 = vmor %vm237_vm2, %vm238_vm1  ;;  %vm247_vm5 = vweird.f32 %v228_v42 }
  0x97   : > { %v233_v46 = vmul.f32 %v377_v41, %v232_v43 }
  0x98   : > { %v226_v47 = vmax.f32 %v222_v44, 0.0  ;;  %v225_v48 = vmax.f32 %v221_v45, 0.0 }
  0x99   : > { %v234_v49 = vmul.f32 0.5, %v233_v46 }
  0x9a   : > { %v230_v50 = vadd.f32 1e-05, %v226_v47  ;;  %v229_v51 = vadd.f32 1e-05, %v225_v48 }
  0x9b   : > { %v235_v52 = vsub.f32 1.5, %v234_v49 }
  0x9c   : > { %380 = vrsqrt.f32 %v230_v50  ;;  %v379_v53 = vpop.eup %378  ;;  %vm267_vm9 = vweird.f32 %v230_v50  ;;  %vm257_vm11 = vweird.f32 %v229_v51 }
  0x9d   : > { %382 = vrsqrt.f32 %v229_v51  ;;  %v236_v54 = vmul.f32 %v377_v41, %v235_v52  ;;  %v242_v55 = vmul.f32 %v379_v53, %v228_v42  ;;  %vm248_vm4 = vweird.f32 %v379_v53 }
  0x9e   : > { %vm249_vm6 = vmor %vm247_vm5, %vm248_vm4 }
  0x9f   : > { %v240_v58 = vsel %vm239_vm3, %v377_v41, %v236_v54  ;;  %v243_v59 = vmul.f32 %v379_v53, %v242_v55 }
  0xa0   : > { %v275_v61 = vmul.f32 %v271_v56, %v240_v58 }
  0xa1   : > { %v244_v63 = vmul.f32 0.5, %v243_v59 }
  0xa2   : > { %v381_v62 = vpop.eup %380  ;;  %v283_v3 = vmul.f32 %v374_v57, %v275_v61 }
  0xa3   : > { %v383_v2 = vpop.eup %382  ;;  %v262_v4 = vmul.f32 %v381_v62, %v230_v50  ;;  %v245_v1 = vsub.f32 1.5, %v244_v63  ;;  %vm268_vm7 = vweird.f32 %v381_v62 }
  0xa4   : > { %v252_v6 = vmul.f32 %v383_v2, %v229_v51  ;;  %v291_v8 = vadd.f32 %v375_v60, %v283_v3  ;;  %vm258_vm8 = vweird.f32 %v383_v2  ;;  %vm269_vm10 = vmor %vm267_vm9, %vm268_vm7 }
  0xa5   : > { %v263_v9 = vmul.f32 %v381_v62, %v262_v4  ;;  %v246_v10 = vmul.f32 %v379_v53, %v245_v1  ;;  %vm259_vm12 = vmor %vm257_vm11, %vm258_vm8 }
  0xa6   : > { %v253_v11 = vmul.f32 %v383_v2, %v252_v6  ;;  %295 = vst.msk [vmem:[%s480_s25] sm:$0xff] %vm178_vm0, %v291_v8 }
  0xa7   : > { %v264_v13 = vmul.f32 0.5, %v263_v9  ;;  %v250_v14 = vsel %vm249_vm6, %v379_v53, %v246_v10 }
  0xa8   : > { %v254_v15 = vmul.f32 0.5, %v253_v11  ;;  %v276_v16 = vmul.f32 %v272_v12, %v250_v14 }
  0xa9   : > { %v265_v17 = vsub.f32 1.5, %v264_v13 }
  0xaa   : > { %v255_v18 = vsub.f32 1.5, %v254_v15  ;;  %v284_v19 = vmul.f32 %v374_v57, %v276_v16 }
  0xab   : > { %v266_v20 = vmul.f32 %v381_v62, %v265_v17 }
  0xac   : > { %v256_v5 = vmul.f32 %v383_v2, %v255_v18  ;;  %v292_v23 = vadd.f32 %v375_v60, %v284_v19 }
  0xad   : > { %v270_v24 = vsel %vm269_vm10, %v381_v62, %v266_v20 }
  0xae   : > { %v278_v25 = vmul.f32 %v274_v21, %v270_v24  ;;  %v260_v26 = vsel %vm259_vm12, %v383_v2, %v256_v5  ;;  %296 = vst.msk [vmem:[%s480_s25 + $0x8] sm:$0xff] %vm178_vm0, %v292_v23 }
  0xaf   : > { %v277_v27 = vmul.f32 %v273_v22, %v260_v26 }
  0xb0   : > { %v286_v28 = vmul.f32 %v374_v57, %v278_v25 }
  0xb1   : > { %v285_v29 = vmul.f32 %v374_v57, %v277_v27 }
  0xb2   : > { %v294_v30 = vadd.f32 %v375_v60, %v286_v28 }
  0xb3   : > { %v293_v7 = vadd.f32 %v375_v60, %v285_v29 }
  0xb4   : > { %298 = vst.msk [vmem:[%s480_s25 + $0x18] sm:$0xff] %vm178_vm0, %v294_v30 }
  0xb5   : > { %297 = vst.msk [vmem:[%s480_s25 + $0x10] sm:$0xff] %vm178_vm0, %v293_v7 }
  0xb6 PF: > { %s13_s12 = sadd.s32 1, %s390_s12  }
  0xb7   : > { %p10_p4 = scmp.ge.s32.totalorder %s13_s12, 6  }
  0xb9   :  { %12 = sbr.rel (!%p10_p4) target bundleno = 1 (0x1), region = 62 }

</bundles_post_ra>
